<compile_context>
chip_gen: v5e
topology: v5e:2x2
jax: 0.10.0
libtpu: 0.0.40
codegen_flags: <defaults>
</compile_context>

<pallas_src>
import functools

import jax
import jax.numpy as jnp
from jax.experimental import pallas as pl
from jax.experimental.pallas import tpu as pltpu


def critic_kernel(x_ref, w1_ref, b1_ref, w2_ref, b2_ref, o_ref, *, mxu_dtype):
    # fc1: (TM, S) @ (S, 128) on the MXU, f32 accumulation.
    x = x_ref[...]
    w1 = w1_ref[...]
    if mxu_dtype is not None:
        # bf16 MXU operands halve HBM/VMEM bytes and double MXU rate on
        # v6e/v7x; accumulator stays f32 via preferred_element_type.
        x = x.astype(mxu_dtype)
        w1 = w1.astype(mxu_dtype)
    h = jnp.dot(x, w1, preferred_element_type=jnp.float32)

    # Epilogue stays in f32 on the VPU (bias add + ReLU).
    h = jnp.maximum(h + b1_ref[...], 0.0)

    # fc2 as VPU broadcast-multiply + XLU lane reduction instead of an N=1
    # MXU matmul (which would use 1/128..1/256 of the systolic array width).
    # w2_ref is the lane-dense (1, 128) row; b2 is a scalar from SMEM.
    v = jnp.sum(h * w2_ref[...], axis=-1, keepdims=True) + b2_ref[0, 0]

    o_ref[...] = v.astype(o_ref.dtype)


def critic_forward(x, w1, b1, w2, b2, *, tm=1024, mxu_dtype=None):
    """Forward pass of the PPO Critic.

    x:  (B, S) f32
    w1: (S, 128) f32, b1: (1, 128) f32
    w2: (128, 1) f32, b2: (1, 1)  f32 (or () / (1,))
    Returns (B, 1) f32.
    """
    B, S = x.shape
    H = w1.shape[1]  # 128

    # Lane-dense fc2 weight row and scalar bias for SMEM.
    w2_row = w2.reshape(1, H).astype(jnp.float32)
    b2_s = jnp.asarray(b2, jnp.float32).reshape(1, 1)

    # Batch tile: multiple of 8 (f32 sublane), no larger than the padded batch.
    # Default tm=1024 keeps the working set (double-buffered x + h + out in
    # f32) far under the 32 MiB scoped / 64 MiB v7x VMEM limits.
    TM = min(tm, max(8, ((B + 7) // 8) * 8))
    TM = ((TM + 7) // 8) * 8
    num_tiles = pl.cdiv(B, TM)
    Bp = num_tiles * TM
    if Bp != B:
        # Zero-pad the tail tile; padded rows are sliced off below.
        x = jnp.pad(x, ((0, Bp - B), (0, 0)))

    kernel = functools.partial(critic_kernel, mxu_dtype=mxu_dtype)

    out = pl.pallas_call(
        kernel,
        out_shape=jax.ShapeDtypeStruct((Bp, 1), jnp.float32),
        grid=(num_tiles,),
        in_specs=[
            pl.BlockSpec((TM, S), lambda i: (i, 0)),   # x: batch-tiled, pipelined
            pl.BlockSpec((S, H), lambda i: (0, 0)),    # w1: resident across steps
            pl.BlockSpec((1, H), lambda i: (0, 0)),    # b1: resident
            pl.BlockSpec((1, H), lambda i: (0, 0)),    # w2 row: resident
            pl.BlockSpec(memory_space=pltpu.MemorySpace.SMEM),  # b2 scalar
        ],
        out_specs=pl.BlockSpec((TM, 1), lambda i: (i, 0)),
        compiler_params=pltpu.CompilerParams(
            dimension_semantics=("parallel",)),  # independent batch tiles -> megacore
    )(x, w1, b1, w2_row, b2_s)

    return out[:B]


def init_params(key, state_size, hidden=128, out=1):
    """Deterministic init mimicking PyTorch nn.Linear default U[-1/sqrt(fan_in), +1/sqrt(fan_in)]."""
    k1, k2, k3, k4 = jax.random.split(key, 4)
    bound1 = 1.0 / jnp.sqrt(state_size)
    bound2 = 1.0 / jnp.sqrt(hidden)
    w1 = jax.random.uniform(k1, (state_size, hidden), jnp.float32, -bound1, bound1)
    b1 = jax.random.uniform(k2, (1, hidden), jnp.float32, -bound1, bound1)
    w2 = jax.random.uniform(k3, (hidden, out), jnp.float32, -bound2, bound2)
    b2 = jax.random.uniform(k4, (1, out), jnp.float32, -bound2, bound2)
    return w1, b1, w2, b2


def _reference(x, w1, b1, w2, b2):
    return jnp.maximum(x @ w1 + b1, 0.0) @ w2 + b2


if __name__ == "__main__":
    key = jax.random.PRNGKey(0)
    k_x, k_p, k_x2 = jax.random.split(key, 3)

    batch = 2
    state_size = 16

    x = jax.random.normal(k_x, (batch, state_size), jnp.float32)
    w1, b1, w2, b2 = init_params(k_p, state_size)

    # Small-batch case (single tile, tail padding path).
    out = critic_forward(x, w1, b1, w2, b2)
    out = jax.block_until_ready(out)
    ref = _reference(x, w1, b1, w2, b2)
    assert out.shape == (batch, 1)
    assert jnp.allclose(out, ref, atol=1e-5, rtol=1e-5)

    # Multi-tile case with a non-divisible batch to exercise the tiled grid
    # and tail handling (TM forced small so grid > 1 at a small shape).
    batch2 = 20
    x2 = jax.random.normal(k_x2, (batch2, state_size), jnp.float32)
    out2 = critic_forward(x2, w1, b1, w2, b2, tm=8)
    out2 = jax.block_until_ready(out2)
    ref2 = _reference(x2, w1, b1, w2, b2)
    assert out2.shape == (batch2, 1)
    assert jnp.allclose(out2, ref2, atol=1e-5, rtol=1e-5)

    print("KERNEL_OK")
</pallas_src>

<mosaic_0001>
module attributes {stable_mosaic.version = 11 : i64} {
  func.func @critic_kernel(%arg0: i32, %arg1: memref<8x16xf32, #tpu.memory_space<vmem>>, %arg2: memref<16x128xf32, #tpu.memory_space<vmem>>, %arg3: memref<1x128xf32, #tpu.memory_space<vmem>>, %arg4: memref<1x128xf32, #tpu.memory_space<vmem>>, %arg5: memref<1x1xf32, #tpu.memory_space<smem>>, %arg6: memref<8x1xf32, #tpu.memory_space<vmem>>) attributes {dimension_semantics = [#tpu.dimension_semantics<parallel>], iteration_bounds = array<i64: 1>, scalar_prefetch = 0 : i64, scratch_operands = 0 : i64, tpu.core_type = #tpu.core_type<tc>, window_params = [{transform_indices = @transform_0, window_bounds = array<i64: 8, 16>}, {pipeline_mode = #tpu.pipeline_mode<synchronous>, transform_indices = @transform_1, window_bounds = array<i64: 16, 128>}, {pipeline_mode = #tpu.pipeline_mode<synchronous>, transform_indices = @transform_2, window_bounds = array<i64: 1, 128>}, {pipeline_mode = #tpu.pipeline_mode<synchronous>, transform_indices = @transform_3, window_bounds = array<i64: 1, 128>}, {transform_indices = @transform_4, window_bounds = array<i64: 1, 1>}, {transform_indices = @transform_5, window_bounds = array<i64: 8, 1>}]} {
    %c0 = arith.constant 0 : index
    %c0_0 = arith.constant 0 : index
    %0 = vector.load %arg1[%c0, %c0_0] : memref<8x16xf32, #tpu.memory_space<vmem>>, vector<8x16xf32>
    %c0_1 = arith.constant 0 : index
    %c0_2 = arith.constant 0 : index
    %1 = vector.load %arg2[%c0_1, %c0_2] : memref<16x128xf32, #tpu.memory_space<vmem>>, vector<16x128xf32>
    %cst = arith.constant dense<0.000000e+00> : vector<8x128xf32>
    %2 = tpu.matmul %0, %1, %cst {dimension_numbers = #tpu.dot_dimension_numbers<[1], [0], [0], [1], [0, 0, 1, 1], [], []>} : vector<8x16xf32>, vector<16x128xf32>, vector<8x128xf32> -> vector<8x128xf32>
    %c0_3 = arith.constant 0 : index
    %c0_4 = arith.constant 0 : index
    %3 = vector.load %arg3[%c0_3, %c0_4] : memref<1x128xf32, #tpu.memory_space<vmem>>, vector<1x128xf32>
    %4 = vector.broadcast %3 : vector<1x128xf32> to vector<8x128xf32>
    %5 = arith.addf %2, %4 : vector<8x128xf32>
    %cst_5 = arith.constant 0.000000e+00 : f32
    %6 = vector.broadcast %cst_5 : f32 to vector<8x128xf32>
    %7 = arith.maximumf %5, %6 : vector<8x128xf32>
    %c0_6 = arith.constant 0 : index
    %c0_7 = arith.constant 0 : index
    %8 = vector.load %arg4[%c0_6, %c0_7] : memref<1x128xf32, #tpu.memory_space<vmem>>, vector<1x128xf32>
    %9 = vector.broadcast %8 : vector<1x128xf32> to vector<8x128xf32>
    %10 = arith.mulf %7, %9 : vector<8x128xf32>
    %cst_8 = arith.constant dense<0.000000e+00> : vector<8xf32>
    %11 = vector.multi_reduction <add>, %10, %cst_8 [1] : vector<8x128xf32> to vector<8xf32>
    %12 = vector.shape_cast %11 : vector<8xf32> to vector<8x1xf32>
    %c0_9 = arith.constant 0 : index
    %c0_10 = arith.constant 0 : index
    %13 = memref.load %arg5[%c0_9, %c0_10] : memref<1x1xf32, #tpu.memory_space<smem>>
    %14 = vector.broadcast %13 : f32 to vector<8x1xf32>
    %15 = arith.addf %12, %14 : vector<8x1xf32>
    %c0_11 = arith.constant 0 : index
    %c0_12 = arith.constant 0 : index
    %16 = vector.load %arg6[%c0_11, %c0_12] : memref<8x1xf32, #tpu.memory_space<vmem>>, vector<8x1xf32>
    tpu.vector_store %arg6[%c0_11, %c0_12], %15 {strides = array<i32>} : memref<8x1xf32, #tpu.memory_space<vmem>>, vector<8x1xf32>,
    return
  }
  func.func @transform_0(%arg0: i32) -> (i32, i32) {
    %c0_i32 = arith.constant 0 : i32
    %c0_i32_0 = arith.constant 0 : i32
    return %arg0, %c0_i32 : i32, i32
  }
  func.func @transform_1(%arg0: i32) -> (i32, i32) {
    %c0_i32 = arith.constant 0 : i32
    %c0_i32_0 = arith.constant 0 : i32
    %c0_i32_1 = arith.constant 0 : i32
    return %c0_i32, %c0_i32_0 : i32, i32
  }
  func.func @transform_2(%arg0: i32) -> (i32, i32) {
    %c0_i32 = arith.constant 0 : i32
    %c0_i32_0 = arith.constant 0 : i32
    %c0_i32_1 = arith.constant 0 : i32
    return %c0_i32, %c0_i32_0 : i32, i32
  }
  func.func @transform_3(%arg0: i32) -> (i32, i32) {
    %c0_i32 = arith.constant 0 : i32
    %c0_i32_0 = arith.constant 0 : i32
    %c0_i32_1 = arith.constant 0 : i32
    return %c0_i32, %c0_i32_0 : i32, i32
  }
  func.func @transform_4(%arg0: i32) -> (i32, i32) {
    %c0_i32 = arith.constant 0 : i32
    %c0_i32_0 = arith.constant 0 : i32
    %c0_i32_1 = arith.constant 0 : i32
    return %c0_i32, %c0_i32_0 : i32, i32
  }
  func.func @transform_5(%arg0: i32) -> (i32, i32) {
    %c0_i32 = arith.constant 0 : i32
    %c0_i32_0 = arith.constant 0 : i32
    return %arg0, %c0_i32 : i32, i32
  }
}

</mosaic_0001>

<bundles_post_ra>
// kernel: tpu_custom_call.1
= control target key start
LH: loop header
LB: loop body
LE: loop exit
PB: predicated region body
PF: predicated region fallthrough
CT: control target
= control target key end

     0   :  { %11 = vsyncpa [#allocation4], 0  ;;  %s212_s0 = inlined_call_operand.hbm [shape: f32[8,16], index: 0, kind: input, shape index: {}]   ;;  %s213_s1 = inlined_call_operand.hbm [shape: f32[16,128], index: 1, kind: input, shape index: {}]   ;;  %s214_s2 = inlined_call_operand.vmem [shape: f32[1,128], index: 2, kind: input, shape index: {}]   ;;  %s215_s3 = inlined_call_operand.vmem [shape: f32[1,128], index: 3, kind: input, shape index: {}]   ;;  %s216_s4 = inlined_call_operand.<no memory space> [shape: f32[1,1], index: 4, kind: input, shape index: {}]   ;;  %s217_s5 = inlined_call_operand.vmem [shape: f32[8,1], index: 5, kind: output, shape index: {}]  }
   0x1   :  { %s18_s20 = sshll.u32 %s212_s0, 4  ;;  %s19_s20 = int_to_ptr.hbm [resolvable:$true] %s18_s20 }
   0x2   :  { %12 = vsyncpa [#allocation6], 0  ;;  %s160_s21 = smov [#allocation3]   ;;  %s28_s25 = sshll.u32 %s213_s1, 4  ;;  %s29_s25 = int_to_ptr.hbm [resolvable:$true] %s28_s25 }
   0x3   :  { %s20_s22 = sshll.u32 %s160_s21, 4  ;;  %s161_s26 = smov [#allocation5]   ;;  %s21_s22 = int_to_ptr.vmem [resolvable:$true] %s20_s22 }
   0x4   :  { %23 = dma.hbm_to_vmem [thread:$0]  %s19_s20, 128, %s21_s22, [#allocation4]  }
   0x5   :  { %s30_s27 = sshll.u32 %s161_s26, 4  ;;  %s162_s28 = smov 128   ;;  %s31_s27 = int_to_ptr.vmem [resolvable:$true] %s30_s27 }
   0x6   :  { %s163_s29 = smov 8  }
   0x7   :  { %36 = dma.hbm_to_vmem [thread:$0]  %s29_s25, 256, %s31_s27, [#allocation6], %s162_s28, %s162_s28, %s163_s29  }
   0x8   :  { %156 = dma.done.wait [#allocation4], 128  }
   0x9   :  { %157 = vsyncadd [#allocation4], 4294967168 }
   0xa   :  { %158 = dma.done.wait [#allocation6], 256  }
   0xb   :  { %159 = vsyncadd [#allocation6], 4294967040  ;;  %v53_v0 = vld [vmem:[#allocation5 + $0x8] sm:$0xff]  ;;  %v52_v1 = vld [vmem:[#allocation5] sm:$0xff]  ;;  %vm58_vm0 = vcmask 130048   ;;  %v91_v9 = vstv %s216_s4  ;;  %vm93_vm1 = vcmask 7168  }
   0xc   :  { %76 = vmatpush.msra.mxu0 %v53_v0  ;;  %v51_v2 = vld [vmem:[#allocation3] sm:$0xff] }
   0xd   :  { %v106_v3 = vld [vmem:[%s214_s2] ss:$0 sm:$0xff] }
   0xe   :  { %77 = vmatpush.msra.mxu0 %v52_v1  ;;  %v107_v6 = vld [vmem:[%s215_s3] ss:$0 sm:$0xff] }
   0xf   :  { %101 = vmatmul.msk.f32.vlgmr.msra.gmra.mxu0 %vm58_vm0, %v51_v2 }
  0x8c   :  { %v79_v4 = vpop.f32.mrf.mxu0 }
  0x8d   :  { %v80_v5 = vadd.f32 %v106_v3, %v79_v4 }
  0x8f   :  { %v82_v7 = vmax.f32 %v80_v5, 0.0 }
  0x91   :  { %v87_v8 = vmul.f32 %v107_v6, %v82_v7 }
  0x93   :  { %88 = vadd.xlane.f32.xlu0 %v87_v8 }
 0x106   :  { %v89_v10 = vpop.xlane.xlu0 %88 }
 0x107   :  { %v92_v11 = vadd.f32 %v91_v9, %v89_v10 }
 0x109   :  { %94 = vst.msk [vmem:[%s217_s5] sm:$0xff] %vm93_vm1, %v92_v11 }
 0x10a   :  { %99 = vsyncpa [#allocation4], 1 }
 0x10b   :  { %100 = vsyncpa [#allocation6], 1 }

</bundles_post_ra>
